<compile_context>
chip_gen: v7x
topology: tpu7x:2x2x1
jax: 0.10.0
libtpu: 0.0.40
codegen_flags: <defaults>
</compile_context>

<pallas_src>
import functools

import jax
import jax.numpy as jnp
from jax.experimental import pallas as pl
from jax.experimental.pallas import tpu as pltpu


# ---------------------------------------------------------------------------
# helpers
# ---------------------------------------------------------------------------
def _patch_params(seq_len, patch_len, stride):
    num_patch = (max(seq_len, patch_len) - patch_len) // stride + 1
    tgt_len = patch_len + stride * (num_patch - 1)
    s_begin = seq_len - tgt_len
    return num_patch, tgt_len, s_begin


def _reference(x, seq_len, patch_len, stride):
    """Pure-JAX reference mirroring torch .unfold semantics (also the small-size path)."""
    num_patch, tgt_len, s_begin = _patch_params(seq_len, patch_len, stride)
    xs = x[:, s_begin:s_begin + tgt_len, :]                       # [bs, tgt_len, n_vars]
    patches = [xs[:, p * stride: p * stride + patch_len, :] for p in range(num_patch)]
    out = jnp.stack(patches, axis=1)                              # [bs, np, patch_len, n_vars]
    return jnp.transpose(out, (0, 1, 3, 2))                       # [bs, np, n_vars, patch_len]


# ---------------------------------------------------------------------------
# kernels
# ---------------------------------------------------------------------------
def _patch_kernel_dense(x_ref, o_ref, *, s_begin, tgt_len):
    # stride == patch_len: the slab IS the transposed window. One transpose, one
    # dense (lane-wide, unmasked) store.
    # x_ref: (bs_tile, seq_len, n_vars); o_ref: (bs_tile, n_vars, tgt_len)
    window = x_ref[:, s_begin:s_begin + tgt_len, :]               # static slice
    o_ref[...] = jnp.swapaxes(window, 1, 2)                       # minor-two-dim transpose


def _patch_kernel_general(x_ref, o_ref, xt_ref, *,
                          s_begin, tgt_len, stride, patch_len, num_patch):
    # General (overlapping / gapped) case:
    #   1) one transpose of the used window into VMEM scratch (O(1) XLU work per tile)
    #   2) num_patch static lane-axis slice copies into the lane-dense output slab.
    # x_ref : (bs_tile, seq_len, n_vars)
    # o_ref : (bs_tile, n_vars, num_patch*patch_len)
    # xt_ref: (bs_tile, n_vars, tgt_len) VMEM scratch
    window = x_ref[:, s_begin:s_begin + tgt_len, :]               # static slice
    xt_ref[...] = jnp.swapaxes(window, 1, 2)
    for p in range(num_patch):                                    # fully static, unrolled
        src = p * stride
        dst = p * patch_len
        o_ref[:, :, dst:dst + patch_len] = xt_ref[:, :, src:src + patch_len]


# ---------------------------------------------------------------------------
# wrapper
# ---------------------------------------------------------------------------
_SMALL_PROBLEM_ELEMS = 128 * 128           # below this, XLA fusion beats pallas_call fixed cost
_VMEM_TILE_BUDGET = 16 * 1024 * 1024       # per-grid-step tile budget (safe on v7x: 64 MiB VMEM)
_MIB = 1024 * 1024


def patch_forward(x, seq_len, patch_len, stride, *,
                  force_pallas=False, vmem_tile_budget=_VMEM_TILE_BUDGET):
    """JAX/Pallas equivalent of Patch.forward.

    x: [bs, seq_len, n_vars]  ->  [bs, num_patch, n_vars, patch_len]
    """
    bs, s_len, n_vars = x.shape
    assert s_len == seq_len
    assert seq_len >= patch_len, "seq_len must be >= patch_len (as in the torch module)"

    num_patch, tgt_len, s_begin = _patch_params(seq_len, patch_len, stride)
    slab_len = num_patch * patch_len
    dense = (stride == patch_len)

    # Tiny problems: the pallas_call fixed cost exceeds the work; let XLA fuse it.
    if not force_pallas and bs * n_vars * slab_len < _SMALL_PROBLEM_ELEMS:
        return _reference(x, seq_len, patch_len, stride)

    # --- batch tiling under an explicit VMEM budget ------------------------
    itemsize = jnp.dtype(x.dtype).itemsize
    per_sample = (
        2 * seq_len * n_vars                      # input block (double-buffered)
        + 2 * n_vars * slab_len                   # output block (double-buffered)
        + (0 if dense else n_vars * tgt_len)      # transpose scratch
    ) * itemsize
    max_tile = max(1, vmem_tile_budget // per_sample)
    bs_tile = 1
    for d in range(1, bs + 1):                    # largest divisor of bs that fits the budget
        if bs % d == 0 and d <= max_tile:
            bs_tile = d
    # TODO(synk): for extreme per-sample sizes (seq_len*n_vars*itemsize >> budget) also
    # tile over n_vars/seq_len instead of relying on bs_tile=1 fitting in VMEM.

    needed = per_sample * bs_tile
    vmem_limit = int(min(48 * _MIB, max(int(1.5 * needed), 16 * _MIB)))

    if dense:
        kernel = functools.partial(_patch_kernel_dense, s_begin=s_begin, tgt_len=tgt_len)
        scratch_shapes = ()
    else:
        kernel = functools.partial(
            _patch_kernel_general,
            s_begin=s_begin, tgt_len=tgt_len,
            stride=stride, patch_len=patch_len, num_patch=num_patch,
        )
        scratch_shapes = (pltpu.VMEM((bs_tile, n_vars, tgt_len), x.dtype),)

    slab = pl.pallas_call(
        kernel,
        out_shape=jax.ShapeDtypeStruct((bs, n_vars, slab_len), x.dtype),
        grid=(bs // bs_tile,),
        in_specs=[
            # last two block dims equal the full array dims -> (8,128) rule satisfied
            pl.BlockSpec((bs_tile, seq_len, n_vars), lambda i: (i, 0, 0)),
        ],
        out_specs=pl.BlockSpec((bs_tile, n_vars, slab_len), lambda i: (i, 0, 0)),
        scratch_shapes=scratch_shapes,
        compiler_params=pltpu.CompilerParams(
            dimension_semantics=("parallel",),    # bs tiles are independent (multi-TC chips)
            vmem_limit_bytes=vmem_limit,
        ),
    )(x)

    # Layout plumbing back to torch.unfold's output layout; minor dim (patch_len)
    # stays minor, only the two middle axes swap -> cheap XLA copy / often fused.
    out = slab.reshape(bs, n_vars, num_patch, patch_len)
    return jnp.transpose(out, (0, 2, 1, 3))       # [bs, num_patch, n_vars, patch_len]


# ---------------------------------------------------------------------------
# self-test
# ---------------------------------------------------------------------------
if __name__ == "__main__":
    key = jax.random.PRNGKey(0)

    configs = [
        # (bs, seq_len, n_vars, patch_len, stride)
        (2, 16, 4, 6, 4),     # overlapping patches, s_begin=2  -> general kernel
        (2, 16, 4, 4, 4),     # stride == patch_len             -> dense (transpose-only) kernel
        (4, 64, 8, 8, 4),     # larger overlapping case, multi-patch unroll
        (2, 32, 16, 8, 8),    # dense kernel with s_begin == 0
    ]
    for (bs, seq_len, n_vars, patch_len, stride) in configs:
        key, sub = jax.random.split(key)
        x = jax.random.normal(sub, (bs, seq_len, n_vars), dtype=jnp.float32)
        out = patch_forward(x, seq_len, patch_len, stride, force_pallas=True)
        out = jax.block_until_ready(out)
        ref = _reference(x, seq_len, patch_len, stride)
        assert out.shape == ref.shape, (out.shape, ref.shape)
        assert jnp.allclose(out, ref), (
            f"Pallas Patch kernel mismatch for cfg {(bs, seq_len, n_vars, patch_len, stride)}"
        )

    # Exercise the bs-tiled path (grid > 1) by shrinking the per-tile VMEM budget.
    key, sub = jax.random.split(key)
    x_tiled = jax.random.normal(sub, (4, 32, 8), dtype=jnp.float32)
    out_tiled = jax.block_until_ready(
        patch_forward(x_tiled, 32, 6, 3, force_pallas=True, vmem_tile_budget=4096)
    )
    assert jnp.allclose(out_tiled, _reference(x_tiled, 32, 6, 3))

    # Small-problem dispatch (falls back to the fused pure-JAX path) still matches.
    key, sub = jax.random.split(key)
    x_small = jax.random.normal(sub, (2, 16, 4), dtype=jnp.float32)
    out_small = jax.block_until_ready(patch_forward(x_small, 16, 6, 4))
    assert jnp.allclose(out_small, _reference(x_small, 16, 6, 4))

    print("KERNEL_OK")
</pallas_src>

<mosaic_0001>
module attributes {stable_mosaic.version = 11 : i64} {
  func.func @_patch_kernel_general(%arg0: i32, %arg1: memref<2x16x4xf32, #tpu.memory_space<vmem>>, %arg2: memref<2x4x18xf32, #tpu.memory_space<vmem>>, %arg3: memref<2x4x14xf32, #tpu.memory_space<vmem>>) attributes {dimension_semantics = [#tpu.dimension_semantics<parallel>], iteration_bounds = array<i64: 1>, scalar_prefetch = 0 : i64, scratch_operands = 1 : i64, tpu.core_type = #tpu.core_type<tc>, window_params = [{transform_indices = @transform_0, window_bounds = array<i64: 2, 16, 4>}, {transform_indices = @transform_1, window_bounds = array<i64: 2, 4, 18>}]} {
    %c0 = arith.constant 0 : index
    %c2 = arith.constant 2 : index
    %c0_0 = arith.constant 0 : index
    %0 = vector.load %arg1[%c0, %c2, %c0_0] : memref<2x16x4xf32, #tpu.memory_space<vmem>>, vector<2x14x4xf32>
    %1 = tpu.transpose %0, [0, 2, 1] : vector<2x14x4xf32> -> vector<2x4x14xf32>
    %c0_1 = arith.constant 0 : index
    %c0_2 = arith.constant 0 : index
    %c0_3 = arith.constant 0 : index
    %2 = vector.load %arg3[%c0_1, %c0_2, %c0_3] : memref<2x4x14xf32, #tpu.memory_space<vmem>>, vector<2x4x14xf32>
    tpu.vector_store %arg3[%c0_1, %c0_2, %c0_3], %1 {strides = array<i32>} : memref<2x4x14xf32, #tpu.memory_space<vmem>>, vector<2x4x14xf32>,
    %c0_4 = arith.constant 0 : index
    %c0_5 = arith.constant 0 : index
    %c0_6 = arith.constant 0 : index
    %3 = vector.load %arg3[%c0_4, %c0_5, %c0_6] : memref<2x4x14xf32, #tpu.memory_space<vmem>>, vector<2x4x6xf32>
    %c0_7 = arith.constant 0 : index
    %c0_8 = arith.constant 0 : index
    %c0_9 = arith.constant 0 : index
    %4 = vector.load %arg2[%c0_7, %c0_8, %c0_9] : memref<2x4x18xf32, #tpu.memory_space<vmem>>, vector<2x4x6xf32>
    tpu.vector_store %arg2[%c0_7, %c0_8, %c0_9], %3 {strides = array<i32>} : memref<2x4x18xf32, #tpu.memory_space<vmem>>, vector<2x4x6xf32>,
    %c0_10 = arith.constant 0 : index
    %c0_11 = arith.constant 0 : index
    %c4 = arith.constant 4 : index
    %5 = vector.load %arg3[%c0_10, %c0_11, %c4] : memref<2x4x14xf32, #tpu.memory_space<vmem>>, vector<2x4x6xf32>
    %c0_12 = arith.constant 0 : index
    %c0_13 = arith.constant 0 : index
    %c6 = arith.constant 6 : index
    %6 = vector.load %arg2[%c0_12, %c0_13, %c6] : memref<2x4x18xf32, #tpu.memory_space<vmem>>, vector<2x4x6xf32>
    tpu.vector_store %arg2[%c0_12, %c0_13, %c6], %5 {strides = array<i32>} : memref<2x4x18xf32, #tpu.memory_space<vmem>>, vector<2x4x6xf32>,
    %c0_14 = arith.constant 0 : index
    %c0_15 = arith.constant 0 : index
    %c8 = arith.constant 8 : index
    %7 = vector.load %arg3[%c0_14, %c0_15, %c8] : memref<2x4x14xf32, #tpu.memory_space<vmem>>, vector<2x4x6xf32>
    %c0_16 = arith.constant 0 : index
    %c0_17 = arith.constant 0 : index
    %c12 = arith.constant 12 : index
    %8 = vector.load %arg2[%c0_16, %c0_17, %c12] : memref<2x4x18xf32, #tpu.memory_space<vmem>>, vector<2x4x6xf32>
    tpu.vector_store %arg2[%c0_16, %c0_17, %c12], %7 {strides = array<i32>} : memref<2x4x18xf32, #tpu.memory_space<vmem>>, vector<2x4x6xf32>,
    return
  }
  func.func @transform_0(%arg0: i32) -> (i32, i32, i32) {
    %c0_i32 = arith.constant 0 : i32
    %c0_i32_0 = arith.constant 0 : i32
    %c0_i32_1 = arith.constant 0 : i32
    return %arg0, %c0_i32, %c0_i32_0 : i32, i32, i32
  }
  func.func @transform_1(%arg0: i32) -> (i32, i32, i32) {
    %c0_i32 = arith.constant 0 : i32
    %c0_i32_0 = arith.constant 0 : i32
    %c0_i32_1 = arith.constant 0 : i32
    return %arg0, %c0_i32, %c0_i32_0 : i32, i32, i32
  }
}

</mosaic_0001>

<bundles_post_ra>
// kernel: tpu_custom_call.1
= control target key start
LH: loop header
LB: loop body
LE: loop exit
PB: predicated region body
PF: predicated region fallthrough
CT: control target
= control target key end

     0   :  { %s197_s0 = inlined_call_operand.vmem [shape: f32[2,16,4], index: 0, kind: input, shape index: {}]   ;;  %s198_s1 = inlined_call_operand.hbm [shape: f32[2,4,18], index: 1, kind: output, shape index: {}]  }
   0x1   :  { %v11_v0 = vld [vmem:[%s197_s0 + $0x12] sm:$0xff]  ;;  %v9_v1 = vld [vmem:[%s197_s0 + $0x2] sm:$0xff] }
   0x2   :  { %45 = vxpose.xlu1.b32.start [1/2] (short) (narrow) %v11_v0, 8  ;;  %13 = vxpose.xlu0.b32.start [1/2] (short) (narrow) %v9_v1, 8 }
   0x3   :  { %6 = vsyncpa [#allocation4], 0  ;;  %v12_v2 = vld [vmem:[%s197_s0 + $0x1a] sm:$0x3f]  ;;  %v10_v3 = vld [vmem:[%s197_s0 + $0xa] sm:$0x3f] }
   0x4   :  { %vm77_vm0 = vcmask 109568   ;;  %vm82_vm1 = vcmask 44032   ;;  %s156_s14 = smov 2   ;;  %s157_s15 = smov 4   ;;  %vm95_vm2 = vcmask 93232   ;;  %vm108_vm3 = vcmask 142432  }
   0x5   :  { %s158_s0 = smov [#allocation3]  }
   0x6   :  { %46 = vxpose.xlu1.b32.end [2/2] (short) (narrow) %v12_v2, 8  ;;  %14 = vxpose.xlu0.b32.end [2/2] (short) (narrow) %v10_v3, 8  ;;  %s116_s16 = sshll.u32 %s158_s0, 4  ;;  %s117_s16 = int_to_ptr.vmem [resolvable:$true] %s116_s16 }
   0x7   :  { %s132_s17 = scalar_lea.vmem %s117_s16, 128  ;;  %p137_p1 = scmp.lt.s32.totalorder %s117_s16, %s117_s16 }
   0x8   :  { %p133_p0 = scmp.ne.s32.totalorder %s117_s16, %s132_s17  ;;  %p138_p2 = scmp.lt.s32.totalorder %s132_s17, %s132_s17 }
   0xa   :  { %p139_p3 = por %p138_p2, %p137_p1 }
   0xc   :  { %p140_p4 = pnand %p139_p3, %p133_p0 }
  0x82   :  { %v61_v4 = vpop.trf.xlu1  ;;  %v29_v5 = vpop.trf.xlu0 }
  0x83   :  { %79 = vst.msk [vmem:[#allocation2 + $0x4] sm:$0xf] %vm77_vm0, %v61_v4  ;;  %78 = vst.msk [vmem:[#allocation2] sm:$0xf] %vm77_vm0, %v29_v5 }
  0x8a   :  { %v86_v6 = vld [vmem:[#allocation2 + $0x4] sm:$0xf]  ;;  %v85_v7 = vld [vmem:[#allocation2] sm:$0xf] }
  0x8b   :  { %91 = vrot.lane.b32.xlu1 %v86_v6, %s156_s14  ;;  %89 = vrot.lane.b32.xlu0 %v85_v7, %s156_s14  ;;  %v81_v8 = vld [vmem:[#allocation2 + $0x4] sm:$0xf]  ;;  %v80_v9 = vld [vmem:[#allocation2] sm:$0xf] }
  0x8c   :  { %v98_v10 = vld [vmem:[#allocation2] sm:$0xf]  ;;  %84 = vst.msk [vmem:[#allocation3 + $0x4] sm:$0xf] %vm82_vm1, %v81_v8  ;;  %83 = vst.msk [vmem:[#allocation3] sm:$0xf] %vm82_vm1, %v80_v9 }
  0x8d   :  { %v99_v11 = vld [vmem:[#allocation2 + $0x4] sm:$0xf] }
  0x8f   :  { %102 = vrot.lane.b32.xlu1 %v98_v10, %s157_s15 }
  0x93   :  { %104 = vrot.lane.b32.xlu1 %v99_v11, %s157_s15 }
  0xfd   :  { %v92_v12 = vpop.permute.xlu1 %91  ;;  %v90_v13 = vpop.permute.xlu0 %89 }
  0xfe   :  { %97 = vst.msk [vmem:[#allocation3 + $0x4] sm:$0xf] %vm95_vm2, %v92_v12  ;;  %96 = vst.msk [vmem:[#allocation3] sm:$0xf] %vm95_vm2, %v90_v13 }
 0x101   :  { %v103_v14 = vpop.permute.xlu1 %102 }
 0x102   :  { %109 = vst.msk [vmem:[#allocation3] sm:$0xf] %vm108_vm3, %v103_v14 }
 0x105   :  { %v105_v15 = vpop.permute.xlu1 %104 }
 0x106   :  { %110 = vst.msk [vmem:[#allocation3 + $0x4] sm:$0xf] %vm108_vm3, %v105_v15 }
 0x107   :  { %143 = shalt.err (!%p140_p4)
}
 0x108   :  { %s144_s20 = scalar_lea.hbm %s198_s1, 128 }
 0x109   :  { %p145_p5 = scmp.ne.s32.totalorder %s198_s1, %s144_s20  ;;  %p148_p6 = scmp.lt.u32.totalorder %s144_s20, %s198_s1 }
 0x10b   :  { %p150_p7 = pnand %p148_p6, %p145_p5 }
 0x10d   :  { %153 = shalt.err (!%p150_p7)
}
 0x10e   :  { %s159_s25 = smov 64  }
 0x10f   :  { %122 = dma.vmem_to_hbm [thread:$0]  %s117_s16, 128, %s198_s1, [#allocation4], %s159_s25, %s159_s25, %s157_s15  }
 0x110   :  { %154 = dma.done.wait [#allocation4], 128  }
 0x111   :  { %155 = vsyncadd [#allocation4], 4294967168 }
 0x112   :  { %126 = vsyncpa [#allocation4], 1 }

</bundles_post_ra>
